<compile_context>
chip_gen: v6e
topology: v6e:2x2x1
jax: 0.10.0
libtpu: 0.0.40
codegen_flags: <defaults>
</compile_context>

<pallas_src>
import jax
import jax.numpy as jnp
import numpy as np
from jax.experimental import pallas as pl
from jax.experimental.pallas import tpu as pltpu


def _pos_emb_kernel(x_ref, e_ref, sel_ref, o_ref):
    # x_ref:   (TB, c_pad)   input rows (zero-padded channels)
    # e_ref:   (c_pad, W)    expansion matrix: E[j, j*C + k] = freqs_tiled[k]
    # sel_ref: (1, W)        int32: 1 -> cos half, 0 -> sin half
    # o_ref:   (TB, W)       output tile in final (b, c*C) layout
    arg = jnp.dot(
        x_ref[...], e_ref[...],
        preferred_element_type=jnp.float32,
        precision=jax.lax.Precision.HIGHEST,
    )                                                   # (TB, W) == x_rep * freqs_tiled
    sel = jnp.broadcast_to(sel_ref[...], arg.shape)     # int32 (TB, W)
    out = jnp.where(sel != 0, jnp.cos(arg), jnp.sin(arg))
    o_ref[...] = out.astype(o_ref.dtype)                # single lane-dense store


def _round_up(n, m):
    return (n + m - 1) // m * m


class PositionalEmbedding:
    """JAX/Pallas port of the PyTorch PositionalEmbedding module."""

    def __init__(self, num_channels, max_positions=10000, endpoint=False,
                 out_dtype=jnp.float32):
        assert num_channels % 2 == 0, "num_channels must be even"
        half = num_channels // 2
        denom = half - (1 if endpoint else 0)
        assert denom > 0, "endpoint=True requires num_channels > 2"
        self.num_channels = num_channels
        self.max_positions = max_positions
        self.endpoint = endpoint
        self.out_dtype = out_dtype
        freqs = jnp.arange(half, dtype=jnp.float32) / float(denom)
        self.freqs = (1.0 / max_positions) ** freqs          # (half,), float32

    def __call__(self, x):
        b, c = x.shape
        nc = self.num_channels
        half = nc // 2
        w = c * nc                                            # output lane width

        # Row tile: ~2 MiB f32 output blocks, multiple of 8 sublanes.
        target_block_bytes = 2 << 20
        tb = max(8, (target_block_bytes // (w * 4)) // 8 * 8)
        tb = min(tb, _round_up(b, 8))
        b_pad = _round_up(b, tb)
        c_pad = _round_up(c, 8)                               # MXU-friendly K

        xf = x.astype(jnp.float32)
        xf = jnp.pad(xf, ((0, b_pad - b), (0, c_pad - c)))    # (b_pad, c_pad)

        # Expansion matrix: arg[i, j*nc + k] = x[i, j] * freqs_tiled[k].
        freqs_tiled = jnp.concatenate([self.freqs, self.freqs])            # (nc,)
        e_mat = jnp.kron(jnp.eye(c, dtype=jnp.float32),
                         freqs_tiled.reshape(1, nc))                       # (c, w)
        e_mat = jnp.pad(e_mat, ((0, c_pad - c), (0, 0)))                   # (c_pad, w)

        sel = ((jnp.arange(w, dtype=jnp.int32) % nc) < half).astype(jnp.int32)
        sel = sel.reshape(1, w)                                            # (1, w)

        grid = (b_pad // tb,)
        out_block = tb * w * 4
        x_block = tb * c_pad * 4
        # double-buffered x/out blocks + resident constants + headroom
        vmem_limit = max(2 * (out_block + x_block) + (c_pad + 1) * w * 4 + (4 << 20),
                         16 << 20)

        out = pl.pallas_call(
            _pos_emb_kernel,
            out_shape=jax.ShapeDtypeStruct((b_pad, w), self.out_dtype),
            grid=grid,
            in_specs=[
                pl.BlockSpec((tb, c_pad), lambda i: (i, 0)),   # x: tiled over rows
                pl.BlockSpec((c_pad, w), lambda i: (0, 0)),    # expansion matrix (resident)
                pl.BlockSpec((1, w), lambda i: (0, 0)),        # cos/sin selector (resident)
            ],
            out_specs=pl.BlockSpec((tb, w), lambda i: (i, 0)),
            compiler_params=pltpu.CompilerParams(
                dimension_semantics=("parallel",),
                vmem_limit_bytes=int(vmem_limit),
            ),
        )(xf, e_mat, sel)

        return out[:b] if b_pad != b else out


def _reference(x, num_channels, max_positions=10000, endpoint=False):
    b, c = x.shape
    half = num_channels // 2
    xf = np.asarray(x, dtype=np.float32).reshape(-1)
    freqs = np.arange(half, dtype=np.float32)
    freqs = freqs / (half - (1 if endpoint else 0))
    freqs = (1.0 / max_positions) ** freqs
    outer = xf[:, None] * freqs[None, :]
    emb = np.concatenate([np.cos(outer), np.sin(outer)], axis=1)
    return emb.reshape(b, c * num_channels)


if __name__ == "__main__":
    key = jax.random.PRNGKey(0)

    # Case 1: typical use (b, c) -> (b, c*num_channels); w = 128 lanes.
    b, c = 2, 4
    num_channels = 32
    x = jax.random.normal(key, (b, c), dtype=jnp.float32) * 10.0
    module = PositionalEmbedding(num_channels=num_channels)
    out = jax.block_until_ready(module(x))
    ref = _reference(np.asarray(x), num_channels)
    assert out.shape == ref.shape
    np.testing.assert_allclose(np.asarray(out), ref, rtol=1e-5, atol=1e-5)

    # Case 2: ragged-row padding path (b=5 padded to a tile of 8).
    b2, c2, nc2 = 5, 2, 64
    x2 = jax.random.normal(jax.random.PRNGKey(1), (b2, c2), dtype=jnp.float32) * 10.0
    module2 = PositionalEmbedding(num_channels=nc2)
    out2 = jax.block_until_ready(module2(x2))
    ref2 = _reference(np.asarray(x2), nc2)
    assert out2.shape == ref2.shape
    np.testing.assert_allclose(np.asarray(out2), ref2, rtol=1e-5, atol=1e-5)

    # Case 3: non-128-multiple width (w=96) and zero-padded K (c=3 -> 8), endpoint=True.
    b3, c3, nc3 = 3, 3, 32
    x3 = jax.random.normal(jax.random.PRNGKey(2), (b3, c3), dtype=jnp.float32) * 10.0
    module3 = PositionalEmbedding(num_channels=nc3, endpoint=True)
    out3 = jax.block_until_ready(module3(x3))
    ref3 = _reference(np.asarray(x3), nc3, endpoint=True)
    assert out3.shape == ref3.shape
    np.testing.assert_allclose(np.asarray(out3), ref3, rtol=1e-5, atol=1e-5)

    print("KERNEL_OK")
</pallas_src>

<mosaic_0001>
module attributes {stable_mosaic.version = 11 : i64} {
  func.func @_pos_emb_kernel(%arg0: i32, %arg1: memref<8x8xf32, #tpu.memory_space<vmem>>, %arg2: memref<8x128xf32, #tpu.memory_space<vmem>>, %arg3: memref<1x128xi32, #tpu.memory_space<vmem>>, %arg4: memref<8x128xf32, #tpu.memory_space<vmem>>) attributes {dimension_semantics = [#tpu.dimension_semantics<parallel>], iteration_bounds = array<i64: 1>, scalar_prefetch = 0 : i64, scratch_operands = 0 : i64, tpu.core_type = #tpu.core_type<tc>, window_params = [{transform_indices = @transform_0, window_bounds = array<i64: 8, 8>}, {pipeline_mode = #tpu.pipeline_mode<synchronous>, transform_indices = @transform_1, window_bounds = array<i64: 8, 128>}, {pipeline_mode = #tpu.pipeline_mode<synchronous>, transform_indices = @transform_2, window_bounds = array<i64: 1, 128>}, {transform_indices = @transform_3, window_bounds = array<i64: 8, 128>}]} {
    %c0 = arith.constant 0 : index
    %c0_0 = arith.constant 0 : index
    %0 = vector.load %arg1[%c0, %c0_0] : memref<8x8xf32, #tpu.memory_space<vmem>>, vector<8x8xf32>
    %c0_1 = arith.constant 0 : index
    %c0_2 = arith.constant 0 : index
    %1 = vector.load %arg2[%c0_1, %c0_2] : memref<8x128xf32, #tpu.memory_space<vmem>>, vector<8x128xf32>
    %cst = arith.constant dense<0.000000e+00> : vector<8x128xf32>
    %2 = tpu.matmul %0, %1, %cst {dimension_numbers = #tpu.dot_dimension_numbers<[1], [0], [0], [1], [0, 0, 1, 1], [], []>, precision = #tpu.contract_precision<fp32>} : vector<8x8xf32>, vector<8x128xf32>, vector<8x128xf32> -> vector<8x128xf32>
    %c0_3 = arith.constant 0 : index
    %c0_4 = arith.constant 0 : index
    %3 = vector.load %arg3[%c0_3, %c0_4] : memref<1x128xi32, #tpu.memory_space<vmem>>, vector<1x128xi32>
    %4 = vector.shape_cast %3 : vector<1x128xi32> to vector<1x128xi32>
    %5 = vector.broadcast %4 : vector<1x128xi32> to vector<8x128xi32>
    %c0_i32 = arith.constant 0 : i32
    %6 = vector.broadcast %c0_i32 : i32 to vector<8x128xi32>
    %7 = arith.cmpi ne, %5, %6 : vector<8x128xi32>
    %8 = math.cos %2 : vector<8x128xf32>
    %9 = math.sin %2 : vector<8x128xf32>
    %10 = arith.select %7, %8, %9 : vector<8x128xi1>, vector<8x128xf32>
    %c0_5 = arith.constant 0 : index
    %c0_6 = arith.constant 0 : index
    %11 = vector.load %arg4[%c0_5, %c0_6] : memref<8x128xf32, #tpu.memory_space<vmem>>, vector<8x128xf32>
    tpu.vector_store %arg4[%c0_5, %c0_6], %10 {strides = array<i32>} : memref<8x128xf32, #tpu.memory_space<vmem>>, vector<8x128xf32>,
    return
  }
  func.func @transform_0(%arg0: i32) -> (i32, i32) {
    %c0_i32 = arith.constant 0 : i32
    %c0_i32_0 = arith.constant 0 : i32
    return %arg0, %c0_i32 : i32, i32
  }
  func.func @transform_1(%arg0: i32) -> (i32, i32) {
    %c0_i32 = arith.constant 0 : i32
    %c0_i32_0 = arith.constant 0 : i32
    %c0_i32_1 = arith.constant 0 : i32
    return %c0_i32, %c0_i32_0 : i32, i32
  }
  func.func @transform_2(%arg0: i32) -> (i32, i32) {
    %c0_i32 = arith.constant 0 : i32
    %c0_i32_0 = arith.constant 0 : i32
    %c0_i32_1 = arith.constant 0 : i32
    return %c0_i32, %c0_i32_0 : i32, i32
  }
  func.func @transform_3(%arg0: i32) -> (i32, i32) {
    %c0_i32 = arith.constant 0 : i32
    %c0_i32_0 = arith.constant 0 : i32
    return %arg0, %c0_i32 : i32, i32
  }
}

</mosaic_0001>

<bundles_post_ra>
// kernel: tpu_custom_call.1
= control target key start
LH: loop header
LB: loop body
LE: loop exit
PB: predicated region body
PF: predicated region fallthrough
CT: control target
= control target key end

     0   :  { %8 = vsyncpa [#allocation3], 0  ;;  %s929_s0 = inlined_call_operand.hbm [shape: f32[8,8], index: 0, kind: input, shape index: {}]   ;;  %s930_s1 = inlined_call_operand.hbm [shape: f32[8,128], index: 1, kind: input, shape index: {}]   ;;  %s931_s2 = inlined_call_operand.vmem [shape: s32[1,128], index: 2, kind: input, shape index: {}]   ;;  %s932_s3 = inlined_call_operand.hbm [shape: f32[8,128], index: 3, kind: output, shape index: {}]  }
   0x1   :  { %9 = vsyncpa [#allocation6], 0 }
   0x2   :  { %10 = vsyncpa [#allocation4], 0  ;;  %s858_s12 = smov [#allocation2]   ;;  %s859_s14 = smov [#allocation5]  }
   0x3   :  { %s17_s13 = sshll.u32 %s858_s12, 4  ;;  %s27_s15 = sshll.u32 %s859_s14, 4  ;;  %s18_s13 = int_to_ptr.vmem [resolvable:$true] %s17_s13  ;;  %s28_s15 = int_to_ptr.vmem [resolvable:$true] %s27_s15 }
   0x4   :  { %s800_s16 = scalar_lea.vmem %s18_s13, 128  ;;  %p805_p1 = scmp.lt.s32.totalorder %s18_s13, %s18_s13 }
   0x5   :  { %p801_p0 = scmp.ne.s32.totalorder %s18_s13, %s800_s16  ;;  %p806_p2 = scmp.lt.s32.totalorder %s800_s16, %s800_s16 }
   0x7   :  { %p807_p3 = por %p806_p2, %p805_p1 }
   0x9   :  { %p808_p4 = pnand %p807_p3, %p801_p0 }
   0xb   :  { %811 = shalt.err (!%p808_p4)
}
   0xc   :  { %20 = dma.hbm_to_vmem [thread:$0]  %s929_s0, 128, %s18_s13, [#allocation3]  }
   0xd   :  { %s820_s19 = scalar_lea.vmem %s28_s15, 128  ;;  %p825_p6 = scmp.lt.s32.totalorder %s28_s15, %s28_s15 }
   0xe   :  { %p821_p5 = scmp.ne.s32.totalorder %s28_s15, %s820_s19  ;;  %p826_p7 = scmp.lt.s32.totalorder %s820_s19, %s820_s19 }
  0x10   :  { %p827_p8 = por %p826_p7, %p825_p6 }
  0x12   :  { %p828_p9 = pnand %p827_p8, %p821_p5 }
  0x14   :  { %831 = shalt.err (!%p828_p9)
}
  0x15   :  { %30 = dma.hbm_to_vmem [thread:$0]  %s930_s1, 128, %s28_s15, [#allocation6]  }
  0x16   :  { %852 = dma.done.wait [#allocation3], 128  }
  0x17   :  { %853 = vsyncadd [#allocation3], 4294967168 }
  0x18   :  { %854 = dma.done.wait [#allocation6], 128  }
  0x19   :  { %855 = vsyncadd [#allocation6], 4294967168  ;;  %v860_v0 = vmov 0.0   ;;  %vm861_vm0 = vmmov 0   ;;  %vm41_vm1 = vcmask 64512   ;;  %v40_v1 = vld [vmem:[#allocation5] sm:$0xff] }
  0x1a   :  { %743 = vmatprep.subr.mxu0 %v860_v0  ;;  %748 = vmatprep.subr.mxu1 %v860_v0  ;;  %v39_v2 = vld [vmem:[#allocation2] sm:$0xff]  ;;  %v76_v3 = vand.u32 4294901760, %v40_v1  ;;  %v862_v41 = vmov 683565275   ;;  %v863_v43 = vmov 2475754826  }
  0x1b   :  { %745 = vmatprep.mubr.msk.f32.mxu0 %vm861_vm0, %v860_v0  ;;  %750 = vmatprep.mubr.msk.f32.mxu1 %vm861_vm0, %v860_v0  ;;  %v43_v4 = vsel %vm41_vm1, %v39_v2, 0  ;;  %v864_v46 = vmov 2131351028   ;;  %v865_v49 = vmov 2102212464   ;;  %s868_s22 = smov [#allocation7]  }
  0x1c   :  { %v111_v5 = vand.u32 4294901760, %v43_v4  ;;  %744 = vmatpush3.msra.mxu0 %v76_v3  ;;  %v153_v6 = vsub.f32 %v40_v1, %v76_v3  ;;  %v866_v52 = vmov 920167782   ;;  %v867_v55 = vmov 1326507024   ;;  %s712_s23 = sshll.u32 %s868_s22, 4  ;;  %s713_s23 = int_to_ptr.vmem [resolvable:$true] %s712_s23 }
  0x1d   :  { %753 = vmatprep.subr.mxu0 %v860_v0  ;;  %p837_p11 = scmp.lt.s32.totalorder %s713_s23, %s713_s23 }
  0x1e   :  { %v112_v7 = vsub.f32 %v43_v4, %v111_v5  ;;  %v154_v8 = vand.u32 4294901760, %v153_v6 }
  0x20   :  { %v113_v9 = vand.u32 4294901760, %v112_v7  ;;  %v155_v10 = vsub.f32 %v153_v6, %v154_v8 }
  0x22   :  { %v114_v11 = vsub.f32 %v112_v7, %v113_v9  ;;  %v156_v12 = vand.u32 4294901760, %v155_v10 }
  0x24   :  { %v115_v13 = vand.u32 4294901760, %v114_v11  ;;  %749 = vmatpush3.msra.mxu1 %v156_v12 }
  0x25   :  { %751 = vmatmul.mubr.f32.vlgmr.msra.gmra.mxu1 %v111_v5  ;;  %758 = vmatprep.subr.mxu1 %v860_v0 }
  0x26   :  { %746 = vmatmul.mubr.f32.vlgmr.msra.gmra.mxu0 %v115_v13  ;;  %759 = vmatpush3.msra.mxu1 %v76_v3 }
  0x27   :  { %754 = vmatpush3.msra.mxu0 %v153_v6  ;;  %755 = vmatprep.mubr.msk.f32.mxu0 %vm861_vm0, %v860_v0 }
  0x28   :  { %760 = vmatprep.mubr.msk.f32.mxu1 %vm861_vm0, %v860_v0  ;;  %763 = vmatprep.subr.mxu0 %v860_v0 }
  0x29   :  { %761 = vmatmul.mubr.f32.vlgmr.msra.gmra.mxu1 %v113_v9  ;;  %768 = vmatprep.subr.mxu1 %v860_v0 }
  0x2a   :  { %756 = vmatmul.mubr.f32.vlgmr.msra.gmra.mxu0 %v112_v7  ;;  %769 = vmatpush3.msra.mxu1 %v76_v3 }
  0x2b   :  { %764 = vmatpush3.msra.mxu0 %v154_v8  ;;  %765 = vmatprep.mubr.msk.f32.mxu0 %vm861_vm0, %v860_v0 }
  0x2c   :  { %770 = vmatprep.mubr.msk.f32.mxu1 %vm861_vm0, %v860_v0 }
  0x2d   :  { %771 = vmatmul.mubr.f32.vlgmr.msra.gmra.mxu1 %v111_v5 }
  0x2e   :  { %766 = vmatmul.mubr.f32.vlgmr.msra.gmra.mxu0 %v111_v5 }
  0xe5   :  { %v193_v15 = vpop.f32.mrf.mxu1 }
  0xe6   :  { %v117_v14 = vpop.f32.mrf.mxu0 }
  0xe7   :  { %v752_v17 = vpop.f32.mrf.mxu1  ;;  %v194_v18 = vadd.f32 %v193_v15, %v117_v14 }
  0xe8   :  { %v747_v16 = vpop.f32.mrf.mxu0 }
  0xe9   :  { %v341_v20 = vpop.f32.mrf.mxu1 }
  0xea   :  { %v267_v19 = vpop.f32.mrf.mxu0 }
  0xeb   :  { %v268_v21 = vadd.f32 %v267_v19, %v194_v18  ;;  %v762_v23 = vpop.f32.mrf.mxu1 }
  0xec   :  { %v757_v22 = vpop.f32.mrf.mxu0 }
  0xed   :  { %v342_v24 = vadd.f32 %v341_v20, %v268_v21  ;;  %v487_v26 = vpop.f32.mrf.mxu1 }
  0xee   :  { %v415_v25 = vpop.f32.mrf.mxu0 }
  0xef   :  { %v416_v27 = vadd.f32 %v415_v25, %v342_v24  ;;  %v772_v29 = vpop.f32.mrf.mxu1 }
  0xf0   :  { %v767_v28 = vpop.f32.mrf.mxu0 }
  0xf1   :  { %v901_v30 = vadd.f32 %v487_v26, %v416_v27 }
  0xf3   :  { %v500_v31 = vand.u32 2139095040, %v901_v30  ;;  %v497_v35 = vand.u32 2147483647, %v901_v30  ;;  %vm499_vm9 = vcmp.lt.s32.totalorder %v901_v30, 0 }
  0xf5   :  { %v501_v32 = vshrl.u32 %v500_v31, 23  ;;  %v504_v38 = vand.u32 8388607, %v497_v35  ;;  %vm498_vm10 = vcmp.le.f32.partialorder %v497_v35, 0.7853982 }
  0xf7   :  { %v723_v33 = vadd.s32 4294967169, %v501_v32  ;;  %v505_v57 = vor.u32 8388608, %v504_v38 }
  0xf9   :  { %v507_v34 = vadd.s32 1, %v723_v33  ;;  %v545_v7 = vshll.u32 %v505_v57, 8 }
  0xfb   :  { %vm508_vm2 = vcmp.gt.s32.totalorder %v507_v34, 0 }
  0xfc   :  { %v509_v36 = vsel %vm508_vm2, %v507_v34, 0  ;;  %vm589_vm2 = vweird.f32 %v901_v30 }
  0xfd   :  { %v511_v37 = vand.u32 31, %v509_v36  ;;  %v510_v40 = vshrl.u32 %v509_v36, 5 }
  0xff   :  { %v512_v39 = vsub.s32 32, %v511_v37  ;;  %v514_v42 = vshll.u32 %v862_v41, %v511_v37  ;;  %v517_v44 = vshll.u32 %v863_v43, %v511_v37  ;;  %v520_v48 = vshll.u32 %v864_v46, %v511_v37 }
 0x100   :  { %v523_v51 = vshll.u32 %v865_v49, %v511_v37  ;;  %v526_v54 = vshll.u32 %v866_v52, %v511_v37  ;;  %vm529_vm3 = vcmp.lt.s32.totalorder %v510_v40, 1  ;;  %vm532_vm4 = vcmp.lt.s32.totalorder %v510_v40, 4 }
 0x101   :  { %v515_v45 = vshrl.u32 %v863_v43, %v512_v39  ;;  %v518_v47 = vshrl.u32 %v864_v46, %v512_v39  ;;  %v521_v50 = vshrl.u32 %v865_v49, %v512_v39  ;;  %v524_v53 = vshrl.u32 %v866_v52, %v512_v39 }
 0x102   :  { %v527_v56 = vshrl.u32 %v867_v55, %v512_v39  ;;  %v513_v2 = vshrl.u32 %v862_v41, %v512_v39  ;;  %vm531_vm5 = vcmp.lt.s32.totalorder %v510_v40, 3  ;;  %vm530_vm6 = vcmp.lt.s32.totalorder %v510_v40, 2 }
 0x103   :  { %v516_v58 = vor.u32 %v515_v45, %v514_v42  ;;  %v519_v59 = vor.u32 %v518_v47, %v517_v44  ;;  %v522_v60 = vor.u32 %v521_v50, %v520_v48  ;;  %v525_v61 = vor.u32 %v524_v53, %v523_v51  ;;  %v722_v53 = vld [vmem:[%s931_s2] ss:$0 sm:$0xff]  ;;  %s832_s2 = scalar_lea.vmem %s713_s23, 128 }
 0x104   :  { %v528_v62 = vor.u32 %v527_v56, %v526_v54  ;;  %vm496_vm11 = vcmp.ne.s32.totalorder %v722_v53, 0  ;;  %p833_p10 = scmp.ne.s32.totalorder %s713_s23, %s832_s2  ;;  %p838_p12 = scmp.lt.s32.totalorder %s832_s2, %s832_s2 }
 0x105   :  { %v534_v63 = vsel %vm532_vm4, %v522_v60, 2102212464  ;;  %v537_v0 = vsel %vm529_vm3, %v516_v58, %v519_v59  ;;  %v541_v1 = vsel %vm529_vm3, %v519_v59, %v522_v60  ;;  %v538_v3 = vsel %vm532_vm4, %v525_v61, 920167782 }
 0x106   :  { %v542_v4 = vsel %vm532_vm4, %v528_v62, 1326507024  ;;  %v539_v5 = vsel %vm531_vm5, %v522_v60, %v538_v3  ;;  %v533_v8 = vsel %vm529_vm3, %v513_v2, %v516_v58  ;;  %v535_v9 = vsel %vm531_vm5, %v519_v59, %v534_v63  ;;  %p839_p13 = por %p838_p12, %p837_p11 }
 0x107   :  { %v543_v6 = vsel %vm531_vm5, %v525_v61, %v542_v4  ;;  %v540_v10 = vsel %vm530_vm6, %v537_v0, %v539_v5  ;;  %v536_v16 = vsel %vm530_vm6, %v533_v8, %v535_v9 }
 0x108   :  { %v544_v11 = vsel %vm530_vm6, %v541_v1, %v543_v6  ;;  %v910_v14 = vmul.u32.u64.low %v545_v7, %v540_v10  ;;  %v911_v15 = vmul.u32.u64.high %v545_v7, %v540_v10, %v910_v14  ;;  %v552_v18 = vmul.u32 %v545_v7, %v536_v16  ;;  %p840_p0 = pnand %p839_p13, %p833_p10 }
 0x109   :  { %v907_v12 = vmul.u32.u64.low %v545_v7, %v544_v11  ;;  %v908_v13 = vmul.u32.u64.high %v545_v7, %v544_v11, %v907_v12 }
 0x10a   :  { %v555_v17 = vadd.s32 1, %v911_v15 }
 0x10b   :  { %vm554_vm7 = vc.u32 %v908_v13, %v910_v14  ;;  %v553_v31 = vadd.s32 %v910_v14, %v908_v13 }
 0x10c   :  { %v556_v19 = vsel %vm554_vm7, %v555_v17, %v911_v15 }
 0x10d   :  { %v557_v20 = vadd.s32 %v556_v19, %v552_v18 }
 0x10f   :  { %v558_v21 = vadd.s32 536870912, %v557_v20 }
 0x111   :  { %v559_v22 = vshrl.u32 %v558_v21, 30 }
 0x113   :  { %v560_v23 = vshll.u32 %v559_v22, 30  ;;  %v583_v45 = vsub.s32 4, %v559_v22 }
 0x115   :  { %v561_v24 = vsub.s32 %v557_v20, %v560_v23  ;;  %v584_v48 = vsel %vm499_vm9, %v583_v45, %v559_v22 }
 0x116   :  { %v586_v49 = vsel %vm498_vm10, 0, %v584_v48 }
 0x117   :  { %v563_v25 = vsub.s32 0, %v561_v24  ;;  %v693_v50 = vadd.s32 3, %v586_v49  ;;  %v590_v51 = vand.u32 3, %v586_v49 }
 0x119   :  { %v724_v26 = vmin.u32 %v563_v25, %v561_v24  ;;  %v694_v52 = vand.u32 3, %v693_v50  ;;  %vm595_vm12 = vcmp.eq.s32.totalorder %v590_v51, 2  ;;  %vm592_vm14 = vcmp.eq.s32.totalorder %v590_v51, 0 }
 0x11a   :  { %vm591_vm0 = vcmp.lt.s32.totalorder %v590_v51, 2 }
 0x11b   :  { %v565_v27 = vclz %v724_v26  ;;  %vm699_vm13 = vcmp.eq.s32.totalorder %v694_v52, 2  ;;  %vm696_vm15 = vcmp.eq.s32.totalorder %v694_v52, 0  ;;  %vm695_vm1 = vcmp.lt.s32.totalorder %v694_v52, 2 }
 0x11d   :  { %v725_v28 = vadd.s32 4294967294, %v565_v27 }
 0x11f   :  { %vm726_vm8 = vcmp.lt.s32.totalorder %v725_v28, 0 }
 0x120   :  { %v568_v29 = vsel %vm726_vm8, 0, %v725_v28 }
 0x121   :  { %v569_v32 = vsub.s32 32, %v568_v29  ;;  %v573_v33 = vsub.s32 4294967266, %v568_v29  ;;  %v570_v34 = vshll.u32 %v561_v24, %v568_v29 }
 0x123   :  { %v571_v36 = vshrl.u32 %v553_v31, %v569_v32  ;;  %v574_v37 = vadd.s32 127, %v573_v33 }
 0x125   :  { %v572_v38 = vor.u32 %v571_v36, %v570_v34  ;;  %v575_v39 = vshll.u32 %v574_v37, 23 }
 0x127   :  { %v576_v40 = vor.u32 4788187, %v575_v39  ;;  %v579_v42 = vcvt.s32.f32 %v572_v38 }
 0x129   :  { %v577_v41 = vand.u32 2147483647, %v576_v40 }
 0x12b   :  { %v580_v43 = vmul.f32 %v579_v42, %v577_v41 }
 0x12d   :  { %v581_v44 = vxor.u32 2147483648, %v580_v43 }
 0x12f   :  { %v582_v46 = vsel %vm499_vm9, %v581_v44, %v580_v43 }
 0x130   :  { %v585_v47 = vsel %vm498_vm10, %v901_v30, %v582_v46 }
 0x131   :  { %788 = vcosq.f32 %v585_v47 }
 0x132   :  { %790 = vsinq.f32 %v585_v47 }
 0x13e   :  { %v789_v54 = vpop.eup %788 }
 0x13f   :  { %v791_v55 = vpop.eup %790  ;;  %v596_v56 = vxor.u32 2147483648, %v789_v54 }
 0x140   :  { %v593_v57 = vxor.u32 2147483648, %v791_v55 }
 0x141   :  { %v597_v35 = vsel %vm595_vm12, %v596_v56, %v791_v55  ;;  %v701_v58 = vsel %vm699_vm13, %v596_v56, %v791_v55 }
 0x142   :  { %v594_v59 = vsel %vm592_vm14, %v789_v54, %v593_v57  ;;  %v698_v60 = vsel %vm696_vm15, %v789_v54, %v593_v57 }
 0x143   :  { %v598_v61 = vsel %vm591_vm0, %v594_v59, %v597_v35  ;;  %v702_v62 = vsel %vm695_vm1, %v698_v60, %v701_v58 }
 0x144   :  { %v599_v63 = vsel %vm589_vm2, nan, %v598_v61  ;;  %v703_v0 = vsel %vm589_vm2, nan, %v702_v62 }
 0x145   :  { %v704_v1 = vsel %vm496_vm11, %v599_v63, %v703_v0 }
 0x146   :  { %705 = vst [vmem:[#allocation7] sm:$0xff] %v704_v1 }
 0x147   :  { %843 = shalt.err (!%p840_p0)
}
 0x148   :  { %715 = dma.vmem_to_hbm [thread:$0]  %s713_s23, 128, %s932_s3, [#allocation4]  }
 0x149   :  { %856 = dma.done.wait [#allocation4], 128  }
 0x14a   :  { %857 = vsyncadd [#allocation4], 4294967168 }
 0x14b   :  { %719 = vsyncpa [#allocation3], 1 }
 0x14c   :  { %720 = vsyncpa [#allocation6], 1 }
 0x14d   :  { %721 = vsyncpa [#allocation4], 1 }

</bundles_post_ra>
